<compile_context>
chip_gen: v6e
topology: v6e:2x2x1
jax: 0.10.0
libtpu: 0.0.40
codegen_flags: <defaults>
</compile_context>

<pallas_src>
import jax
import jax.numpy as jnp
from jax.experimental import pallas as pl
from jax.experimental.pallas import tpu as pltpu

_MiB = 1024 * 1024


def _tpu_hw_params():
    """Best-effort (vmem_budget_bytes, num_tensorcores) for class-block sizing."""
    budget = 12 * _MiB          # conservative fallback: fits v5e's 16 MiB scoped default
    num_tc = 1
    vmem_cap = None
    try:
        vmem_cap = int(getattr(pltpu.get_tpu_info(), "vmem_capacity_bytes"))
    except Exception:
        vmem_cap = None
    try:
        kind = jax.devices()[0].device_kind.lower()
    except Exception:
        kind = ""
    if ("v7" in kind) or ("tpu7" in kind):
        num_tc = 2              # two TensorCores share HBM; split the grid across them
    if vmem_cap:
        # Stay well under physical VMEM; the explicit vmem_limit_bytes below covers
        # the rest (double-buffers are counted explicitly in _plan_class_blocks).
        budget = min(vmem_cap // 2, 32 * _MiB)
    elif "v6" in kind:
        budget = 24 * _MiB      # 128 MiB physical / 32 MiB default scoped limit
    elif ("v7" in kind) or ("tpu7" in kind):
        budget = 24 * _MiB      # 64 MiB physical / 32 MiB default scoped limit
    return budget, num_tc


def _plan_class_blocks(n_cls, rows_in_per_cls, L, n_ctx, D, itemsize, budget, num_tc,
                       max_class_block=None):
    """Pick classes-per-block (tc), grid steps, padded class count, and VMEM need.

    Double-buffered VMEM footprint of one grid step:
      per class : input rows (prefix + suffix [+ suffix_nocls]) + 2*L output rows
      shared    : ctx + ctx_double (2 * n_ctx rows)
    """
    per_class = 2 * (rows_in_per_cls + 2 * L) * D * itemsize   # x2: double-buffered
    shared = 2 * (2 * n_ctx) * D * itemsize
    cap = max(1, (budget - shared) // per_class)
    if max_class_block is not None:
        cap = max(1, min(cap, int(max_class_block)))
    steps = pl.cdiv(n_cls, min(cap, n_cls))      # fewest steps that respect the budget
    if num_tc > 1 and n_cls > 1:
        steps = max(steps, num_tc)               # give every TensorCore work on v7x
    tc = pl.cdiv(n_cls, steps)
    steps = pl.cdiv(n_cls, tc)
    if num_tc > 1 and n_cls > 1 and steps % num_tc:
        steps += num_tc - (steps % num_tc)       # even class-block split across TCs
    n_cls_padded = tc * steps
    vmem_need = tc * per_class + shared
    return tc, steps, n_cls_padded, vmem_need


def _make_prompt_kernel(tc, n_ctx, D, shared_suffix):
    """Kernel body for a block of `tc` classes.

    Each output tile is assembled with one concatenate along the sublane axis and
    written with a single aligned full-block store (no masked partial stores).
    Refs are read at each use site so nothing large stays live in vregs.
    """
    if shared_suffix:
        def kernel(prefix_ref, ctx_ref, ctxd_ref, suffix_ref,
                   prompts_ref, prompts_neg_ref):
            prompts_ref[...] = jnp.concatenate(
                [prefix_ref[...],
                 jnp.broadcast_to(ctx_ref[...], (tc, n_ctx, D)),
                 suffix_ref[...]], axis=1)
            prompts_neg_ref[...] = jnp.concatenate(
                [prefix_ref[...],
                 jnp.broadcast_to(ctxd_ref[...], (tc, n_ctx, D)),
                 suffix_ref[...]], axis=1)
        return kernel

    def kernel(prefix_ref, ctx_ref, ctxd_ref, suffix_ref, suffix_nocls_ref,
               prompts_ref, prompts_neg_ref):
        prompts_ref[...] = jnp.concatenate(
            [prefix_ref[...],
             jnp.broadcast_to(ctx_ref[...], (tc, n_ctx, D)),
             suffix_ref[...]], axis=1)
        prompts_neg_ref[...] = jnp.concatenate(
            [prefix_ref[...],
             jnp.broadcast_to(ctxd_ref[...], (tc, n_ctx, D)),
             suffix_nocls_ref[...]], axis=1)
    return kernel


def _pad_classes(x, n_cls_padded):
    n = x.shape[0]
    if n == n_cls_padded:
        return x
    pad = [(0, n_cls_padded - n)] + [(0, 0)] * (x.ndim - 1)
    return jnp.pad(x, pad)


def prompt_learner_forward(params, neg_prompt_wcls=True, max_class_block=None):
    """JAX/Pallas equivalent of PromptLearner.forward (class_token_position == 'end',
    generic (non-CSC) context). Returns (prompts, prompts_neg, temperature, spatial_T,
    ranking_scale)."""
    ctx = params["ctx"]                          # (n_ctx, D)
    ctx_double = params["ctx_double"]            # (n_ctx, D)
    prefix = params["token_prefix"]              # (n_cls, 1, D)
    suffix = params["token_suffix"]              # (n_cls, S, D)
    suffix_nocls = params["token_suffix_nocls"]  # (n_cls, S, D)

    n_cls, _, D = prefix.shape
    n_ctx = ctx.shape[0]
    S = suffix.shape[1]
    L = 1 + n_ctx + S
    itemsize = jnp.dtype(prefix.dtype).itemsize

    shared_suffix = bool(neg_prompt_wcls)
    rows_in_per_cls = (1 + S) if shared_suffix else (1 + 2 * S)

    budget, num_tc = _tpu_hw_params()
    tc, steps, n_cls_padded, vmem_need = _plan_class_blocks(
        n_cls, rows_in_per_cls, L, n_ctx, D, itemsize, budget, num_tc,
        max_class_block=max_class_block)

    prefix_p = _pad_classes(prefix, n_cls_padded)
    suffix_p = _pad_classes(suffix, n_cls_padded)

    kernel = _make_prompt_kernel(tc, n_ctx, D, shared_suffix)

    in_specs = [
        pl.BlockSpec((tc, 1, D), lambda i: (i, 0, 0)),   # prefix, per class-block
        pl.BlockSpec((n_ctx, D), lambda i: (0, 0)),      # ctx, grid-invariant
        pl.BlockSpec((n_ctx, D), lambda i: (0, 0)),      # ctx_double, grid-invariant
        pl.BlockSpec((tc, S, D), lambda i: (i, 0, 0)),   # suffix, per class-block
    ]
    inputs = [prefix_p, ctx, ctx_double, suffix_p]
    read_elems = prefix_p.size + ctx.size + ctx_double.size + suffix_p.size
    if not shared_suffix:
        suffix_nocls_p = _pad_classes(suffix_nocls, n_cls_padded)
        in_specs.append(pl.BlockSpec((tc, S, D), lambda i: (i, 0, 0)))
        inputs.append(suffix_nocls_p)
        read_elems += suffix_nocls_p.size
    write_elems = 2 * n_cls_padded * L * D

    cost = pl.CostEstimate(flops=0, transcendentals=0,
                           bytes_accessed=int((read_elems + write_elems) * itemsize))

    grid_spec = pltpu.PrefetchScalarGridSpec(
        num_scalar_prefetch=0,
        grid=(steps,),
        in_specs=in_specs,
        out_specs=[
            pl.BlockSpec((tc, L, D), lambda i: (i, 0, 0)),   # prompts
            pl.BlockSpec((tc, L, D), lambda i: (i, 0, 0)),   # prompts_neg
        ],
    )

    # Explicit scoped-VMEM limit: computed tile footprint + margin; safe on every
    # generation (<= ~36 MiB, below v7x's 64 MiB physical VMEM).
    vmem_limit = int(min(max(vmem_need + 4 * _MiB, 16 * _MiB), 48 * _MiB))

    prompts, prompts_neg = pl.pallas_call(
        kernel,
        out_shape=(
            jax.ShapeDtypeStruct((n_cls_padded, L, D), prefix.dtype),
            jax.ShapeDtypeStruct((n_cls_padded, L, D), prefix.dtype),
        ),
        grid_spec=grid_spec,
        compiler_params=pltpu.CompilerParams(
            dimension_semantics=("parallel",),
            vmem_limit_bytes=vmem_limit),
        cost_estimate=cost,
    )(*inputs)

    if n_cls_padded != n_cls:
        prompts = prompts[:n_cls]
        prompts_neg = prompts_neg[:n_cls]

    return (prompts, prompts_neg,
            params["temperature"], params["spatial_T"], params["ranking_scale"])


def _reference_forward(params, neg_prompt_wcls=True):
    ctx = params["ctx"]
    ctx_double = params["ctx_double"]
    prefix = params["token_prefix"]
    suffix = params["token_suffix"]
    suffix_nocls = params["token_suffix_nocls"]
    n_cls = prefix.shape[0]
    ctx_b = jnp.broadcast_to(ctx[None], (n_cls,) + ctx.shape)
    ctxd_b = jnp.broadcast_to(ctx_double[None], (n_cls,) + ctx_double.shape)
    prompts = jnp.concatenate([prefix, ctx_b, suffix], axis=1)
    suf_neg = suffix if neg_prompt_wcls else suffix_nocls
    prompts_neg = jnp.concatenate([prefix, ctxd_b, suf_neg], axis=1)
    return prompts, prompts_neg


def init_params(key, n_cls=8, n_ctx=4, ctx_dim=128, total_len=16, dtype=jnp.float32):
    # Deterministic synthetic init mirroring the module's __init__ shapes:
    #   ctx / ctx_double ~ Normal(0, 0.02), shape (n_ctx, ctx_dim)   (generic / non-CSC)
    #   token_prefix       (n_cls, 1, ctx_dim)                       (SOS embedding)
    #   token_suffix       (n_cls, total_len - 1 - n_ctx, ctx_dim)   (class name + EOS + pad)
    #   token_suffix_nocls (n_cls, total_len - 1 - n_ctx, ctx_dim)
    #   temperature = 3.0, spatial_T = 3.0, ranking_scale = 4.0
    suffix_len = total_len - 1 - n_ctx
    k1, k2, k3, k4, k5 = jax.random.split(key, 5)
    params = {
        "ctx": (0.02 * jax.random.normal(k1, (n_ctx, ctx_dim))).astype(dtype),
        "ctx_double": (0.02 * jax.random.normal(k2, (n_ctx, ctx_dim))).astype(dtype),
        "token_prefix": jax.random.normal(k3, (n_cls, 1, ctx_dim)).astype(dtype),
        "token_suffix": jax.random.normal(k4, (n_cls, suffix_len, ctx_dim)).astype(dtype),
        "token_suffix_nocls": jax.random.normal(k5, (n_cls, suffix_len, ctx_dim)).astype(dtype),
        "temperature": jnp.asarray(3.0, dtype),
        "spatial_T": jnp.asarray(3.0, dtype),
        "ranking_scale": jnp.asarray(4.0, dtype),
    }
    return params


if __name__ == "__main__":
    # TODO(synk): 'middle'/'front' class_token_position paths (ragged per-class name_lens
    # concatenation) and the CSC class-specific-context branch are not kernelized; only
    # the default 'end' / generic-context path is.
    key = jax.random.PRNGKey(0)
    # D=128 keeps output stores lane-dense (full 128-lane vst); other dims stay small.
    params = init_params(key, n_cls=8, n_ctx=4, ctx_dim=128, total_len=16)

    prompts, prompts_neg, temperature, spatial_T, ranking_scale = jax.block_until_ready(
        prompt_learner_forward(params, neg_prompt_wcls=True))

    # Correctness check against a pure-JAX reference.
    ref_prompts, ref_prompts_neg = _reference_forward(params, neg_prompt_wcls=True)
    assert prompts.shape == (8, 16, 128)
    assert prompts_neg.shape == (8, 16, 128)
    assert jnp.allclose(prompts, ref_prompts)
    assert jnp.allclose(prompts_neg, ref_prompts_neg)
    assert float(temperature) == 3.0
    assert float(spatial_T) == 3.0
    assert float(ranking_scale) == 4.0

    # neg_prompt_wcls=False branch (suffix_nocls, 5-input kernel).
    _, prompts_neg_nocls, _, _, _ = jax.block_until_ready(
        prompt_learner_forward(params, neg_prompt_wcls=False))
    _, ref_neg_nocls = _reference_forward(params, neg_prompt_wcls=False)
    assert jnp.allclose(prompts_neg_nocls, ref_neg_nocls)

    # Non-divisor n_cls with a forced small class block: exercises the padded-tail path.
    params7 = init_params(jax.random.PRNGKey(1), n_cls=7, n_ctx=4, ctx_dim=128, total_len=16)
    p7, p7n, _, _, _ = jax.block_until_ready(
        prompt_learner_forward(params7, neg_prompt_wcls=True, max_class_block=3))
    r7, r7n = _reference_forward(params7, neg_prompt_wcls=True)
    assert p7.shape == (7, 16, 128)
    assert jnp.allclose(p7, r7)
    assert jnp.allclose(p7n, r7n)

    print("KERNEL_OK")
</pallas_src>

<mosaic_0001>
module attributes {stable_mosaic.version = 11 : i64} {
  func.func @kernel(%arg0: i32, %arg1: memref<8x1x128xf32, #tpu.memory_space<vmem>>, %arg2: memref<4x128xf32, #tpu.memory_space<vmem>>, %arg3: memref<4x128xf32, #tpu.memory_space<vmem>>, %arg4: memref<8x11x128xf32, #tpu.memory_space<vmem>>, %arg5: memref<8x16x128xf32, #tpu.memory_space<vmem>>, %arg6: memref<8x16x128xf32, #tpu.memory_space<vmem>>) attributes {dimension_semantics = [#tpu.dimension_semantics<parallel>], iteration_bounds = array<i64: 1>, scalar_prefetch = 0 : i64, scratch_operands = 0 : i64, tpu.core_type = #tpu.core_type<tc>, window_params = [{transform_indices = @transform_0, window_bounds = array<i64: 8, 1, 128>}, {pipeline_mode = #tpu.pipeline_mode<synchronous>, transform_indices = @transform_1, window_bounds = array<i64: 4, 128>}, {pipeline_mode = #tpu.pipeline_mode<synchronous>, transform_indices = @transform_2, window_bounds = array<i64: 4, 128>}, {transform_indices = @transform_3, window_bounds = array<i64: 8, 11, 128>}, {transform_indices = @transform_4, window_bounds = array<i64: 8, 16, 128>}, {transform_indices = @transform_5, window_bounds = array<i64: 8, 16, 128>}]} {
    %c0 = arith.constant 0 : index
    %c0_0 = arith.constant 0 : index
    %c0_1 = arith.constant 0 : index
    %0 = vector.load %arg1[%c0, %c0_0, %c0_1] : memref<8x1x128xf32, #tpu.memory_space<vmem>>, vector<8x1x128xf32>
    %c0_2 = arith.constant 0 : index
    %c0_3 = arith.constant 0 : index
    %1 = vector.load %arg2[%c0_2, %c0_3] : memref<4x128xf32, #tpu.memory_space<vmem>>, vector<4x128xf32>
    %2 = vector.shape_cast %1 : vector<4x128xf32> to vector<1x4x128xf32>
    %3 = vector.broadcast %2 : vector<1x4x128xf32> to vector<8x4x128xf32>
    %c0_4 = arith.constant 0 : index
    %c0_5 = arith.constant 0 : index
    %c0_6 = arith.constant 0 : index
    %4 = vector.load %arg4[%c0_4, %c0_5, %c0_6] : memref<8x11x128xf32, #tpu.memory_space<vmem>>, vector<8x11x128xf32>
    %5 = tpu.concatenate %0, %3, %4 in 1 : vector<8x1x128xf32>, vector<8x4x128xf32>, vector<8x11x128xf32> -> vector<8x16x128xf32>
    %c0_7 = arith.constant 0 : index
    %c0_8 = arith.constant 0 : index
    %c0_9 = arith.constant 0 : index
    %6 = vector.load %arg5[%c0_7, %c0_8, %c0_9] : memref<8x16x128xf32, #tpu.memory_space<vmem>>, vector<8x16x128xf32>
    tpu.vector_store %arg5[%c0_7, %c0_8, %c0_9], %5 {strides = array<i32>} : memref<8x16x128xf32, #tpu.memory_space<vmem>>, vector<8x16x128xf32>,
    %c0_10 = arith.constant 0 : index
    %c0_11 = arith.constant 0 : index
    %c0_12 = arith.constant 0 : index
    %7 = vector.load %arg1[%c0_10, %c0_11, %c0_12] : memref<8x1x128xf32, #tpu.memory_space<vmem>>, vector<8x1x128xf32>
    %c0_13 = arith.constant 0 : index
    %c0_14 = arith.constant 0 : index
    %8 = vector.load %arg3[%c0_13, %c0_14] : memref<4x128xf32, #tpu.memory_space<vmem>>, vector<4x128xf32>
    %9 = vector.shape_cast %8 : vector<4x128xf32> to vector<1x4x128xf32>
    %10 = vector.broadcast %9 : vector<1x4x128xf32> to vector<8x4x128xf32>
    %c0_15 = arith.constant 0 : index
    %c0_16 = arith.constant 0 : index
    %c0_17 = arith.constant 0 : index
    %11 = vector.load %arg4[%c0_15, %c0_16, %c0_17] : memref<8x11x128xf32, #tpu.memory_space<vmem>>, vector<8x11x128xf32>
    %12 = tpu.concatenate %7, %10, %11 in 1 : vector<8x1x128xf32>, vector<8x4x128xf32>, vector<8x11x128xf32> -> vector<8x16x128xf32>
    %c0_18 = arith.constant 0 : index
    %c0_19 = arith.constant 0 : index
    %c0_20 = arith.constant 0 : index
    %13 = vector.load %arg6[%c0_18, %c0_19, %c0_20] : memref<8x16x128xf32, #tpu.memory_space<vmem>>, vector<8x16x128xf32>
    tpu.vector_store %arg6[%c0_18, %c0_19, %c0_20], %12 {strides = array<i32>} : memref<8x16x128xf32, #tpu.memory_space<vmem>>, vector<8x16x128xf32>,
    return
  }
  func.func @transform_0(%arg0: i32) -> (i32, i32, i32) {
    %c0_i32 = arith.constant 0 : i32
    %c0_i32_0 = arith.constant 0 : i32
    %c0_i32_1 = arith.constant 0 : i32
    return %arg0, %c0_i32, %c0_i32_0 : i32, i32, i32
  }
  func.func @transform_1(%arg0: i32) -> (i32, i32) {
    %c0_i32 = arith.constant 0 : i32
    %c0_i32_0 = arith.constant 0 : i32
    %c0_i32_1 = arith.constant 0 : i32
    return %c0_i32, %c0_i32_0 : i32, i32
  }
  func.func @transform_2(%arg0: i32) -> (i32, i32) {
    %c0_i32 = arith.constant 0 : i32
    %c0_i32_0 = arith.constant 0 : i32
    %c0_i32_1 = arith.constant 0 : i32
    return %c0_i32, %c0_i32_0 : i32, i32
  }
  func.func @transform_3(%arg0: i32) -> (i32, i32, i32) {
    %c0_i32 = arith.constant 0 : i32
    %c0_i32_0 = arith.constant 0 : i32
    %c0_i32_1 = arith.constant 0 : i32
    return %arg0, %c0_i32, %c0_i32_0 : i32, i32, i32
  }
  func.func @transform_4(%arg0: i32) -> (i32, i32, i32) {
    %c0_i32 = arith.constant 0 : i32
    %c0_i32_0 = arith.constant 0 : i32
    %c0_i32_1 = arith.constant 0 : i32
    return %arg0, %c0_i32, %c0_i32_0 : i32, i32, i32
  }
  func.func @transform_5(%arg0: i32) -> (i32, i32, i32) {
    %c0_i32 = arith.constant 0 : i32
    %c0_i32_0 = arith.constant 0 : i32
    %c0_i32_1 = arith.constant 0 : i32
    return %arg0, %c0_i32, %c0_i32_0 : i32, i32, i32
  }
}

</mosaic_0001>

<bundles_post_ra>
// kernel: tpu_custom_call.1
= control target key start
LH: loop header
LB: loop body
LE: loop exit
PB: predicated region body
PF: predicated region fallthrough
CT: control target
= control target key end

     0   :  { %11 = vsyncpa [#allocation3], 0  ;;  %vm65_vm0 = vcmask 1044480   ;;  %vm106_vm1 = vcmask 1040384   ;;  %s335_s23 = smov [#allocation2]   ;;  %s617_s0 = inlined_call_operand.vmem [shape: f32[8,1,128], index: 0, kind: input, shape index: {}]   ;;  %s618_s1 = inlined_call_operand.vmem [shape: f32[4,128], index: 1, kind: input, shape index: {}]   ;;  %s619_s2 = inlined_call_operand.vmem [shape: f32[4,128], index: 2, kind: input, shape index: {}]   ;;  %s620_s3 = inlined_call_operand.vmem [shape: f32[8,11,128], index: 3, kind: input, shape index: {}]   ;;  %s621_s4 = inlined_call_operand.hbm [shape: f32[8,16,128], index: 4, kind: output, shape index: {0}]   ;;  %s622_s5 = inlined_call_operand.hbm [shape: f32[8,16,128], index: 5, kind: output, shape index: {1}]  }
   0x1   :  { %v21_v0 = vld [vmem:[%s617_s0] sm:$0x1]  ;;  %v31_v5 = vld [vmem:[%s620_s3 + $0x8] sm:$0x7]  ;;  %v32_v6 = vld [vmem:[%s620_s3 + $0x10] sm:$0xff]  ;;  %s260_s24 = sshll.u32 %s335_s23, 4  ;;  %s261_s24 = int_to_ptr.vmem [resolvable:$true] %s260_s24 }
   0x2   :  { %v29_v1 = vld [vmem:[%s618_s1] sm:$0xf]  ;;  %v67_v7 = vrot.slane %v31_v5, 3  ;;  %v391_v9 = vrot.slane %v32_v6, 3  ;;  %v33_v10 = vld [vmem:[%s620_s3 + $0x18] sm:$0x7] }
   0x3   :  { %v30_v2 = vld [vmem:[%s620_s3] sm:$0xff]  ;;  %v378_v3 = vrot.slane %v29_v1, 7  ;;  %v70_v13 = vrot.slane %v33_v10, 3  ;;  %v35_v16 = vld [vmem:[%s620_s3 + $0x28] sm:$0x7]  ;;  %v36_v22 = vld [vmem:[%s620_s3 + $0x30] sm:$0xff] }
   0x4   :  { %v380_v4 = vrot.slane %v30_v2, 3  ;;  %v22_v8 = vld [vmem:[%s617_s0 + $0x1] sm:$0x1]  ;;  %v23_v14 = vld [vmem:[%s617_s0 + $0x2] sm:$0x1]  ;;  %v73_v26 = vrot.slane %v35_v16, 3 }
   0x5   :  { %v107_v11 = vsel %vm106_vm1, %v21_v0, %v378_v3  ;;  %v108_v12 = vsel %vm106_vm1, %v22_v8, %v378_v3  ;;  %v34_v15 = vld [vmem:[%s620_s3 + $0x20] sm:$0xff]  ;;  %v37_v23 = vld [vmem:[%s620_s3 + $0x38] sm:$0x7]  ;;  %v71_v24 = vsel %vm65_vm0, %v391_v9, %v70_v13  ;;  %v109_v25 = vsel %vm106_vm1, %v23_v14, %v378_v3  ;;  %v40_v30 = vld [vmem:[%s620_s3 + $0x50] sm:$0xff] }
   0x6   :  { %v115_v17 = vsel %vm65_vm0, %v107_v11, %v380_v4  ;;  %v68_v18 = vsel %vm65_vm0, %v380_v4, %v67_v7  ;;  %v116_v19 = vsel %vm65_vm0, %v108_v12, %v391_v9  ;;  %v415_v20 = vrot.slane %v34_v15, 3  ;;  %v24_v21 = vld [vmem:[%s617_s0 + $0x3] sm:$0x1]  ;;  %v25_v28 = vld [vmem:[%s617_s0 + $0x4] sm:$0x1]  ;;  %126 = vst [vmem:[#allocation2 + $0x18] sm:$0xff] %v71_v24 }
   0x7   :  { %123 = vst [vmem:[#allocation2] sm:$0xff] %v115_v17  ;;  %124 = vst [vmem:[#allocation2 + $0x8] sm:$0xff] %v68_v18  ;;  %v430_v27 = vrot.slane %v36_v22, 3  ;;  %v38_v29 = vld [vmem:[%s620_s3 + $0x40] sm:$0xff]  ;;  %v110_v32 = vsel %vm106_vm1, %v24_v21, %v378_v3  ;;  %v76_v33 = vrot.slane %v37_v23, 3  ;;  %v111_v39 = vsel %vm106_vm1, %v25_v28, %v378_v3  ;;  %v44_v50 = vld [vmem:[%s620_s3 + $0x70] sm:$0xff] }
   0x8   :  { %125 = vst [vmem:[#allocation2 + $0x10] sm:$0xff] %v116_v19  ;;  %v117_v31 = vsel %vm65_vm0, %v109_v25, %v415_v20  ;;  %v445_v34 = vrot.slane %v38_v29, 3  ;;  %v39_v35 = vld [vmem:[%s620_s3 + $0x48] sm:$0x7]  ;;  %v26_v36 = vld [vmem:[%s617_s0 + $0x5] sm:$0x1]  ;;  %v74_v37 = vsel %vm65_vm0, %v415_v20, %v73_v26 }
   0x9   :  { %127 = vst [vmem:[#allocation2 + $0x20] sm:$0xff] %v117_v31  ;;  %v118_v38 = vsel %vm65_vm0, %v110_v32, %v430_v27  ;;  %v79_v40 = vrot.slane %v39_v35, 3  ;;  %v41_v41 = vld [vmem:[%s620_s3 + $0x58] sm:$0x7]  ;;  %v27_v42 = vld [vmem:[%s617_s0 + $0x6] sm:$0x1]  ;;  %v77_v44 = vsel %vm65_vm0, %v430_v27, %v76_v33  ;;  %v112_v47 = vsel %vm106_vm1, %v26_v36, %v378_v3 }
   0xa   :  { %v42_v43 = vld [vmem:[%s620_s3 + $0x60] sm:$0xff]  ;;  %128 = vst [vmem:[#allocation2 + $0x28] sm:$0xff] %v74_v37  ;;  %129 = vst [vmem:[#allocation2 + $0x30] sm:$0xff] %v118_v38  ;;  %v119_v45 = vsel %vm65_vm0, %v111_v39, %v445_v34  ;;  %v472_v46 = vrot.slane %v40_v30, 3  ;;  %v43_v48 = vld [vmem:[%s620_s3 + $0x68] sm:$0x7]  ;;  %v113_v54 = vsel %vm106_vm1, %v27_v42, %v378_v3 }
   0xb   :  { %v28_v49 = vld [vmem:[%s617_s0 + $0x7] sm:$0x1]  ;;  %130 = vst [vmem:[#allocation2 + $0x38] sm:$0xff] %v77_v44  ;;  %131 = vst [vmem:[#allocation2 + $0x40] sm:$0xff] %v119_v45  ;;  %v80_v51 = vsel %vm65_vm0, %v445_v34, %v79_v40  ;;  %v82_v52 = vrot.slane %v41_v41, 3  ;;  %v487_v53 = vrot.slane %v42_v43, 3 }
   0xc   :  { %v45_v55 = vld [vmem:[%s620_s3 + $0x78] sm:$0x7]  ;;  %v139_v56 = vld [vmem:[%s617_s0] sm:$0x1]  ;;  %132 = vst [vmem:[#allocation2 + $0x48] sm:$0xff] %v80_v51  ;;  %v120_v57 = vsel %vm65_vm0, %v112_v47, %v472_v46  ;;  %v85_v58 = vrot.slane %v43_v48, 3  ;;  %v114_v60 = vsel %vm106_vm1, %v28_v49, %v378_v3 }
   0xd   :  { %v499_v59 = vrot.slane %v44_v50, 3  ;;  %v147_v61 = vld [vmem:[%s619_s2] sm:$0xf]  ;;  %v149_v62 = vld [vmem:[%s620_s3 + $0x8] sm:$0x7]  ;;  %133 = vst [vmem:[#allocation2 + $0x50] sm:$0xff] %v120_v57  ;;  %v83_v63 = vsel %vm65_vm0, %v472_v46, %v82_v52  ;;  %v121_v0 = vsel %vm65_vm0, %v113_v54, %v487_v53 }
   0xe   :  { %v88_v1 = vrot.slane %v45_v55, 3  ;;  %v513_v2 = vrot.slane %v147_v61, 7  ;;  %v140_v3 = vld [vmem:[%s617_s0 + $0x1] sm:$0x1]  ;;  %v151_v5 = vld [vmem:[%s620_s3 + $0x18] sm:$0x7]  ;;  %v86_v6 = vsel %vm65_vm0, %v487_v53, %v85_v58 }
   0xf   :  { %134 = vst [vmem:[#allocation2 + $0x58] sm:$0xff] %v83_v63  ;;  %135 = vst [vmem:[#allocation2 + $0x60] sm:$0xff] %v121_v0  ;;  %v122_v7 = vsel %vm65_vm0, %v114_v60, %v499_v59  ;;  %v184_v8 = vrot.slane %v149_v62, 3  ;;  %v187_v10 = vrot.slane %v151_v5, 3  ;;  %v141_v11 = vld [vmem:[%s617_s0 + $0x2] sm:$0x1] }
  0x10   :  { %v153_v12 = vld [vmem:[%s620_s3 + $0x28] sm:$0x7]  ;;  %136 = vst [vmem:[#allocation2 + $0x68] sm:$0xff] %v86_v6  ;;  %137 = vst [vmem:[#allocation2 + $0x70] sm:$0xff] %v122_v7  ;;  %v89_v13 = vsel %vm65_vm0, %v499_v59, %v88_v1  ;;  %v223_v14 = vsel %vm106_vm1, %v139_v56, %v513_v2  ;;  %v224_v15 = vsel %vm106_vm1, %v140_v3, %v513_v2  ;;  %v142_v17 = vld [vmem:[%s617_s0 + $0x3] sm:$0x1] }
  0x11   :  { %v225_v16 = vsel %vm106_vm1, %v141_v11, %v513_v2  ;;  %v155_v18 = vld [vmem:[%s620_s3 + $0x38] sm:$0x7]  ;;  %v143_v19 = vld [vmem:[%s617_s0 + $0x4] sm:$0x1]  ;;  %138 = vst [vmem:[#allocation2 + $0x78] sm:$0xff] %v89_v13  ;;  %v231_v21 = vsel %vm65_vm0, %v223_v14, %v380_v4  ;;  %v185_v22 = vsel %vm65_vm0, %v380_v4, %v184_v8  ;;  %v232_v23 = vsel %vm65_vm0, %v224_v15, %v391_v9 }
  0x12   :  { %v188_v24 = vsel %vm65_vm0, %v391_v9, %v187_v10  ;;  %v157_v25 = vld [vmem:[%s620_s3 + $0x48] sm:$0x7]  ;;  %v144_v26 = vld [vmem:[%s617_s0 + $0x5] sm:$0x1]  ;;  %v159_v28 = vld [vmem:[%s620_s3 + $0x58] sm:$0x7]  ;;  %v233_v4 = vsel %vm65_vm0, %v225_v16, %v415_v20  ;;  %v226_v29 = vsel %vm106_vm1, %v142_v17, %v513_v2  ;;  %v227_v35 = vsel %vm106_vm1, %v143_v19, %v513_v2 }
  0x13   :  { %239 = vst [vmem:[#allocation4] sm:$0xff] %v231_v21  ;;  %240 = vst [vmem:[#allocation4 + $0x8] sm:$0xff] %v185_v22  ;;  %v190_v9 = vrot.slane %v153_v12, 3  ;;  %v193_v30 = vrot.slane %v155_v18, 3  ;;  %v145_v31 = vld [vmem:[%s617_s0 + $0x6] sm:$0x1]  ;;  %v234_v33 = vsel %vm65_vm0, %v226_v29, %v430_v27  ;;  %v228_v37 = vsel %vm106_vm1, %v144_v26, %v513_v2 }
  0x14   :  { %241 = vst [vmem:[#allocation4 + $0x10] sm:$0xff] %v232_v23  ;;  %242 = vst [vmem:[#allocation4 + $0x18] sm:$0xff] %v188_v24  ;;  %v161_v32 = vld [vmem:[%s620_s3 + $0x68] sm:$0x7]  ;;  %v196_v36 = vrot.slane %v157_v25, 3  ;;  %v235_v42 = vsel %vm65_vm0, %v227_v35, %v445_v34  ;;  %v236_v43 = vsel %vm65_vm0, %v228_v37, %v472_v46 }
  0x15   :  { %243 = vst [vmem:[#allocation4 + $0x20] sm:$0xff] %v233_v4  ;;  %v146_v38 = vld [vmem:[%s617_s0 + $0x7] sm:$0x1]  ;;  %v163_v39 = vld [vmem:[%s620_s3 + $0x78] sm:$0x7]  ;;  %v191_v40 = vsel %vm65_vm0, %v415_v20, %v190_v9  ;;  %245 = vst [vmem:[#allocation4 + $0x30] sm:$0xff] %v234_v33  ;;  %v194_v41 = vsel %vm65_vm0, %v430_v27, %v193_v30 }
  0x16   :  { %12 = vsyncpa [#allocation5], 0  ;;  %244 = vst [vmem:[#allocation4 + $0x28] sm:$0xff] %v191_v40  ;;  %v197_v44 = vsel %vm65_vm0, %v445_v34, %v196_v36  ;;  %v199_v20 = vrot.slane %v159_v28, 3  ;;  %v229_v27 = vsel %vm106_vm1, %v145_v31, %v513_v2  ;;  %v202_v45 = vrot.slane %v161_v32, 3  ;;  %s291_s0 = scalar_lea.vmem %s261_s24, 2048  ;;  %p296_p1 = scmp.lt.s32.totalorder %s261_s24, %s261_s24 }
  0x17   :  { %246 = vst [vmem:[#allocation4 + $0x38] sm:$0xff] %v194_v41  ;;  %247 = vst [vmem:[#allocation4 + $0x40] sm:$0xff] %v235_v42  ;;  %v237_v47 = vsel %vm65_vm0, %v229_v27, %v487_v53  ;;  %v230_v48 = vsel %vm106_vm1, %v146_v38, %v513_v2  ;;  %v205_v49 = vrot.slane %v163_v39, 3  ;;  %p292_p0 = scmp.ne.s32.totalorder %s261_s24, %s291_s0  ;;  %p297_p2 = scmp.lt.s32.totalorder %s291_s0, %s291_s0 }
  0x18   :  { %249 = vst [vmem:[#allocation4 + $0x50] sm:$0xff] %v236_v43  ;;  %248 = vst [vmem:[#allocation4 + $0x48] sm:$0xff] %v197_v44 }
  0x19   :  { %p298_p3 = por %p297_p2, %p296_p1 }
  0x1b   :  { %p299_p4 = pnand %p298_p3, %p292_p0 }
  0x1d   :  { %302 = shalt.err (!%p299_p4)
}
  0x1e   :  { %s336_s3 = smov 128   ;;  %s337_s2 = smov 8   ;;  %v200_v34 = vsel %vm65_vm0, %v472_v46, %v199_v20  ;;  %251 = vst [vmem:[#allocation4 + $0x60] sm:$0xff] %v237_v47  ;;  %v203_v50 = vsel %vm65_vm0, %v487_v53, %v202_v45  ;;  %v238_v51 = vsel %vm65_vm0, %v230_v48, %v499_v59  ;;  %v206_v52 = vsel %vm65_vm0, %v499_v59, %v205_v49 }
  0x1f   :  { %266 = dma.vmem_to_hbm [thread:$0]  %s261_s24, 2048, %s621_s4, [#allocation3], %s336_s3, %s336_s3, %s337_s2   ;;  %250 = vst [vmem:[#allocation4 + $0x58] sm:$0xff] %v200_v34  ;;  %252 = vst [vmem:[#allocation4 + $0x68] sm:$0xff] %v203_v50 }
  0x20   :  { %253 = vst [vmem:[#allocation4 + $0x70] sm:$0xff] %v238_v51  ;;  %s338_s27 = smov [#allocation4]   ;;  %254 = vst [vmem:[#allocation4 + $0x78] sm:$0xff] %v206_v52 }
  0x21   :  { %s272_s1 = sshll.u32 %s338_s27, 4  ;;  %s273_s1 = int_to_ptr.vmem [resolvable:$true] %s272_s1 }
  0x22   :  { %s311_s4 = scalar_lea.vmem %s273_s1, 2048  ;;  %p316_p6 = scmp.lt.s32.totalorder %s273_s1, %s273_s1 }
  0x23   :  { %p312_p5 = scmp.ne.s32.totalorder %s273_s1, %s311_s4  ;;  %p317_p7 = scmp.lt.s32.totalorder %s311_s4, %s311_s4 }
  0x25   :  { %p318_p8 = por %p317_p7, %p316_p6 }
  0x27   :  { %p319_p9 = pnand %p318_p8, %p312_p5 }
  0x29   :  { %322 = shalt.err (!%p319_p9)
}
  0x2a   :  { %278 = dma.vmem_to_hbm [thread:$0]  %s273_s1, 2048, %s622_s5, [#allocation5], %s336_s3, %s336_s3, %s337_s2  }
  0x2b   :  { %331 = dma.done.wait [#allocation3], 2048  }
  0x2c   :  { %332 = vsyncadd [#allocation3], 4294965248 }
  0x2d   :  { %333 = dma.done.wait [#allocation5], 2048  }
  0x2e   :  { %334 = vsyncadd [#allocation5], 4294965248 }
  0x2f   :  { %285 = vsyncpa [#allocation3], 1 }
  0x30   :  { %286 = vsyncpa [#allocation5], 1 }

</bundles_post_ra>
